<compile_context>
chip_gen: v7x
topology: tpu7x:2x2x1
jax: 0.10.0
libtpu: 0.0.40
codegen_flags: <defaults>
</compile_context>

<pallas_src>
import math

import jax
import jax.numpy as jnp
import numpy as np
from jax.experimental import pallas as pl
from jax.experimental.pallas import tpu as pltpu


def _pick_query_tile(S):
    """Largest power-of-two query tile (<=256, multiple of 8) dividing S."""
    if S <= 256:
        return S
    for cand in (256, 128, 64, 32, 16, 8):
        if S % cand == 0:
            return cand
    return S  # fall back to a single query tile


def _make_sa_kernel(num_heads, head_dim, all_head):
    """Returns a kernel closed over the (static) head geometry."""

    def kernel(xq_ref, xkv_ref, wq_ref, bq_ref, wkv_ref, bkv_ref, mask_ref,
               out_ref, kv_ref, ctx_ref):
        # Refs (per grid point (b, q)):
        #   xq_ref   : (1, TQ, S_hidden)   query-tile hidden states (f32)
        #   xkv_ref  : (1, S,  S_hidden)   full-sequence hidden states (f32)
        #   wq_ref   : (H, AH)             Wq * 1/sqrt(dh)            (bf16)
        #   bq_ref   : (1, AH)             bq * 1/sqrt(dh)            (f32)
        #   wkv_ref  : (H, 2*AH)           [Wk | Wv]                  (bf16)
        #   bkv_ref  : (1, 2*AH)           [bk | bv]                  (f32)
        #   mask_ref : (1, TQ, S)          attention mask (1=keep)    (bf16)
        #   out_ref  : (1, TQ, AH)         context output             (f32)
        #   kv_ref   : (S, 2*AH)  VMEM scratch, persists across q tiles (bf16)
        #   ctx_ref  : (TQ, AH)   VMEM scratch for per-head context     (f32)

        # Project K/V once per batch (q-tile 0); reused by later q tiles.
        @pl.when(pl.program_id(1) == 0)
        def _():
            xkv = xkv_ref[0].astype(jnp.bfloat16)                       # (S, H)
            kv = jnp.dot(xkv, wkv_ref[...],
                         preferred_element_type=jnp.float32) + bkv_ref[...]
            kv_ref[...] = kv.astype(jnp.bfloat16)                       # (S, 2*AH)

        # Per-query-tile (already scaled) Q projection; single bf16 cast.
        xq = xq_ref[0].astype(jnp.bfloat16)                             # (TQ, H)
        q_all = (jnp.dot(xq, wq_ref[...],
                         preferred_element_type=jnp.float32)
                 + bq_ref[...]).astype(jnp.bfloat16)                    # (TQ, AH)

        # Additive mask in f32, computed once per step (shared by all heads).
        add_mask = (1.0 - mask_ref[0].astype(jnp.float32)) * (-10000.0)  # (TQ, S)

        for h in range(num_heads):
            lo = h * head_dim
            hi = lo + head_dim
            q_h = q_all[:, lo:hi]                                       # (TQ, dh)
            k_h = kv_ref[:, lo:hi]                                      # (S, dh)
            v_h = kv_ref[:, all_head + lo:all_head + hi]                # (S, dh)

            scores = jnp.dot(q_h, k_h.T,
                             preferred_element_type=jnp.float32)        # (TQ, S)
            scores = scores + add_mask
            # Numerically-stable exp (row max subtracted; all f32).
            scores = scores - jnp.max(scores, axis=-1, keepdims=True)
            p = jnp.exp(scores)
            denom = jnp.sum(p, axis=-1, keepdims=True)                  # (TQ, 1)

            # Deferred normalization: PV matmul on unnormalized probs, then
            # scale the small (TQ, dh) result by the reciprocal row sum.
            ctx_un = jnp.dot(p.astype(jnp.bfloat16), v_h,
                             preferred_element_type=jnp.float32)        # (TQ, dh)
            ctx_ref[:, lo:hi] = ctx_un * pl.reciprocal(denom, approx=True)

        # Single lane-dense store of the full (TQ, all_head) context, already
        # in the head-major layout matching PyTorch's permute(0,2,1,3)+view.
        out_ref[0] = ctx_ref[...].astype(out_ref.dtype)

    return kernel


def sa_layer_pallas(hidden_states, attention_mask, params, num_attention_heads):
    """hidden_states: (B, S, H) f32, attention_mask: (B, S, S) of 0/1 floats."""
    B, S, H = hidden_states.shape
    Wq, bq, Wk, bk, Wv, bv = params           # Wq: (H, all_head), bq: (all_head,)
    all_head = Wq.shape[1]
    nh = num_attention_heads
    dh = all_head // nh
    scale = 1.0 / math.sqrt(dh)

    # Plain-JAX glue (cheap): fold the 1/sqrt(dh) scale into the Q projection,
    # fuse K/V weights, and shrink the mask HBM stream to bf16.
    w_q = (Wq * scale).astype(jnp.bfloat16)                               # (H, AH)
    b_q = (bq * scale).reshape(1, all_head).astype(jnp.float32)           # (1, AH)
    w_kv = jnp.concatenate([Wk, Wv], axis=1).astype(jnp.bfloat16)         # (H, 2*AH)
    b_kv = jnp.concatenate([bk, bv], axis=0).reshape(1, 2 * all_head)
    b_kv = b_kv.astype(jnp.float32)
    mask_bf16 = attention_mask.astype(jnp.bfloat16)

    TQ = _pick_query_tile(S)
    n_q = S // TQ

    kernel = _make_sa_kernel(nh, dh, all_head)

    # Rough per-step VMEM working-set estimate -> explicit scoped limit with
    # headroom (capped at the v7x 64 MiB physical ceiling).
    est = (2 * (TQ * H * 4 + S * H * 4 + TQ * S * 2 + TQ * all_head * 4)   # io blocks (dbl-buffered)
           + H * 3 * all_head * 2 + 3 * all_head * 4                       # fused weights / biases
           + S * 2 * all_head * 2 + TQ * all_head * 4                      # kv / ctx scratch
           + 4 * TQ * S * 4 + S * 2 * all_head * 4)                        # f32 temporaries
    vmem_limit = int(min(max(est * 1.5, 32 * 1024 * 1024), 64 * 1024 * 1024))

    out = pl.pallas_call(
        kernel,
        out_shape=jax.ShapeDtypeStruct((B, S, all_head), jnp.float32),
        grid=(B, n_q),
        in_specs=[
            pl.BlockSpec((1, TQ, H), lambda b, q: (b, q, 0)),        # query-tile x
            pl.BlockSpec((1, S, H), lambda b, q: (b, 0, 0)),         # full-seq x (for K/V)
            pl.BlockSpec((H, all_head), lambda b, q: (0, 0)),        # Wq (scaled)
            pl.BlockSpec((1, all_head), lambda b, q: (0, 0)),        # bq (scaled)
            pl.BlockSpec((H, 2 * all_head), lambda b, q: (0, 0)),    # [Wk | Wv]
            pl.BlockSpec((1, 2 * all_head), lambda b, q: (0, 0)),    # [bk | bv]
            pl.BlockSpec((1, TQ, S), lambda b, q: (b, q, 0)),        # mask (bf16)
        ],
        out_specs=pl.BlockSpec((1, TQ, all_head), lambda b, q: (b, q, 0)),
        scratch_shapes=[
            pltpu.VMEM((S, 2 * all_head), jnp.bfloat16),             # resident K/V
            pltpu.VMEM((TQ, all_head), jnp.float32),                 # per-head ctx
        ],
        compiler_params=pltpu.CompilerParams(
            dimension_semantics=("parallel", "arbitrary"),
            vmem_limit_bytes=vmem_limit),
    )(hidden_states, hidden_states, w_q, b_q, w_kv, b_kv, mask_bf16)

    return out   # (B, S, all_head) in the PyTorch layout


def sa_layer_ref(hidden_states, attention_mask, params, num_attention_heads):
    """Pure-JAX f32 reference mirroring the PyTorch forward exactly."""
    B, S, H = hidden_states.shape
    Wq, bq, Wk, bk, Wv, bv = params
    all_head = Wq.shape[1]
    nh = num_attention_heads
    dh = all_head // nh

    def proj(W, b):
        y = hidden_states @ W + b                       # (B, S, all_head)
        y = y.reshape(B, S, nh, dh)
        return jnp.transpose(y, (0, 2, 1, 3))           # (B, nh, S, dh)

    q, k, v = proj(Wq, bq), proj(Wk, bk), proj(Wv, bv)
    scores = jnp.einsum("bhqd,bhkd->bhqk", q / math.sqrt(dh), k)
    ext = (1.0 - attention_mask[:, None, :, :]) * (-10000.0)  # unsqueeze(1)
    scores = scores + ext
    probs = jax.nn.softmax(scores, axis=-1)
    ctx = jnp.einsum("bhqk,bhkd->bhqd", probs, v)
    ctx = jnp.transpose(ctx, (0, 2, 1, 3)).reshape(B, S, all_head)
    return ctx


def _make_params(key, H, all_head):
    ks = jax.random.split(key, 6)
    std = 0.02
    Wq = std * jax.random.normal(ks[0], (H, all_head), dtype=jnp.float32)
    bq = std * jax.random.normal(ks[1], (all_head,), dtype=jnp.float32)
    Wk = std * jax.random.normal(ks[2], (H, all_head), dtype=jnp.float32)
    bk = std * jax.random.normal(ks[3], (all_head,), dtype=jnp.float32)
    Wv = std * jax.random.normal(ks[4], (H, all_head), dtype=jnp.float32)
    bv = std * jax.random.normal(ks[5], (all_head,), dtype=jnp.float32)
    return (Wq, bq, Wk, bk, Wv, bv)


if __name__ == "__main__":
    key = jax.random.PRNGKey(0)

    # --- Case 1: small shape matching the module defaults -------------------
    B, S, H = 2, 8, 32
    num_heads = 2
    all_head = H  # attention_head_size defaults to hidden_size // num_heads

    k0, k1, k2 = jax.random.split(key, 3)
    hidden_states = jax.random.normal(k0, (B, S, H), dtype=jnp.float32)
    attention_mask = jnp.ones((B, S, S), dtype=jnp.float32)
    attention_mask = attention_mask.at[:, :, -2:].set(0.0)   # mask last 2 keys
    params = _make_params(k1, H, all_head)

    out = sa_layer_pallas(hidden_states, attention_mask, params, num_heads)
    out = jax.block_until_ready(out)
    ref = sa_layer_ref(hidden_states, attention_mask, params, num_heads)
    # bf16 MXU operands + approx reciprocal -> loosen tolerance vs f32 reference.
    np.testing.assert_allclose(np.asarray(out), np.asarray(ref),
                               rtol=5e-2, atol=1e-2)

    # --- Case 2: longer sequence to exercise the query-tile grid axis -------
    B2, S2, H2, nh2 = 1, 512, 64, 4
    ka, kb, kc = jax.random.split(k2, 3)
    hs2 = jax.random.normal(ka, (B2, S2, H2), dtype=jnp.float32)
    am2 = (jax.random.uniform(kb, (B2, S2, S2)) > 0.1).astype(jnp.float32)
    am2 = am2.at[:, :, 0].set(1.0)   # keep at least one key per row
    params2 = _make_params(kc, H2, H2)

    out2 = sa_layer_pallas(hs2, am2, params2, nh2)
    out2 = jax.block_until_ready(out2)
    ref2 = sa_layer_ref(hs2, am2, params2, nh2)
    np.testing.assert_allclose(np.asarray(out2), np.asarray(ref2),
                               rtol=5e-2, atol=1e-2)

    print("KERNEL_OK")
</pallas_src>

<mosaic_0001>
module attributes {stable_mosaic.version = 11 : i64} {
  func.func @kernel(%arg0: i32, %arg1: i32, %arg2: memref<1x8x32xf32, #tpu.memory_space<vmem>>, %arg3: memref<1x8x32xf32, #tpu.memory_space<vmem>>, %arg4: memref<32x32xbf16, #tpu.memory_space<vmem>>, %arg5: memref<1x32xf32, #tpu.memory_space<vmem>>, %arg6: memref<32x64xbf16, #tpu.memory_space<vmem>>, %arg7: memref<1x64xf32, #tpu.memory_space<vmem>>, %arg8: memref<1x8x8xbf16, #tpu.memory_space<vmem>>, %arg9: memref<1x8x32xf32, #tpu.memory_space<vmem>>, %arg10: memref<8x64xbf16, #tpu.memory_space<vmem>>, %arg11: memref<8x32xf32, #tpu.memory_space<vmem>>) attributes {dimension_semantics = [#tpu.dimension_semantics<parallel>, #tpu.dimension_semantics<arbitrary>], iteration_bounds = array<i64: 2, 1>, scalar_prefetch = 0 : i64, scratch_operands = 2 : i64, tpu.core_type = #tpu.core_type<tc>, window_params = [{transform_indices = @transform_0, window_bounds = array<i64: 1, 8, 32>}, {transform_indices = @transform_1, window_bounds = array<i64: 1, 8, 32>}, {pipeline_mode = #tpu.pipeline_mode<synchronous>, transform_indices = @transform_2, window_bounds = array<i64: 32, 32>}, {pipeline_mode = #tpu.pipeline_mode<synchronous>, transform_indices = @transform_3, window_bounds = array<i64: 1, 32>}, {pipeline_mode = #tpu.pipeline_mode<synchronous>, transform_indices = @transform_4, window_bounds = array<i64: 32, 64>}, {pipeline_mode = #tpu.pipeline_mode<synchronous>, transform_indices = @transform_5, window_bounds = array<i64: 1, 64>}, {transform_indices = @transform_6, window_bounds = array<i64: 1, 8, 8>}, {transform_indices = @transform_7, window_bounds = array<i64: 1, 8, 32>}]} {
    %c0_i32 = arith.constant 0 : i32
    %0 = arith.cmpi eq, %arg1, %c0_i32 : i32
    %1 = arith.extui %0 : i1 to i32
    %c0_i32_0 = arith.constant 0 : i32
    %2 = arith.cmpi ne, %1, %c0_i32_0 : i32
    scf.if %2 {
      %c0_34 = arith.constant 0 : index
      %c0_35 = arith.constant 0 : index
      %c0_36 = arith.constant 0 : index
      %61 = vector.load %arg3[%c0_34, %c0_35, %c0_36] : memref<1x8x32xf32, #tpu.memory_space<vmem>>, vector<1x8x32xf32>
      %62 = vector.shape_cast %61 : vector<1x8x32xf32> to vector<8x32xf32>
      %63 = arith.truncf %62 : vector<8x32xf32> to vector<8x32xbf16>
      %c0_37 = arith.constant 0 : index
      %c0_38 = arith.constant 0 : index
      %64 = vector.load %arg6[%c0_37, %c0_38] : memref<32x64xbf16, #tpu.memory_space<vmem>>, vector<32x64xbf16>
      %cst_39 = arith.constant dense<0.000000e+00> : vector<8x64xf32>
      %65 = tpu.matmul %63, %64, %cst_39 {dimension_numbers = #tpu.dot_dimension_numbers<[1], [0], [0], [1], [0, 0, 1, 1], [], []>} : vector<8x32xbf16>, vector<32x64xbf16>, vector<8x64xf32> -> vector<8x64xf32>
      %c0_40 = arith.constant 0 : index
      %c0_41 = arith.constant 0 : index
      %66 = vector.load %arg7[%c0_40, %c0_41] : memref<1x64xf32, #tpu.memory_space<vmem>>, vector<1x64xf32>
      %67 = vector.broadcast %66 : vector<1x64xf32> to vector<8x64xf32>
      %68 = arith.addf %65, %67 : vector<8x64xf32>
      %69 = arith.truncf %68 : vector<8x64xf32> to vector<8x64xbf16>
      %c0_42 = arith.constant 0 : index
      %c0_43 = arith.constant 0 : index
      %70 = vector.load %arg10[%c0_42, %c0_43] : memref<8x64xbf16, #tpu.memory_space<vmem>>, vector<8x64xbf16>
      tpu.vector_store %arg10[%c0_42, %c0_43], %69 {strides = array<i32>} : memref<8x64xbf16, #tpu.memory_space<vmem>>, vector<8x64xbf16>,
    } else {
    }
    %c0 = arith.constant 0 : index
    %c0_1 = arith.constant 0 : index
    %c0_2 = arith.constant 0 : index
    %3 = vector.load %arg2[%c0, %c0_1, %c0_2] : memref<1x8x32xf32, #tpu.memory_space<vmem>>, vector<1x8x32xf32>
    %4 = vector.shape_cast %3 : vector<1x8x32xf32> to vector<8x32xf32>
    %5 = arith.truncf %4 : vector<8x32xf32> to vector<8x32xbf16>
    %c0_3 = arith.constant 0 : index
    %c0_4 = arith.constant 0 : index
    %6 = vector.load %arg4[%c0_3, %c0_4] : memref<32x32xbf16, #tpu.memory_space<vmem>>, vector<32x32xbf16>
    %cst = arith.constant dense<0.000000e+00> : vector<8x32xf32>
    %7 = tpu.matmul %5, %6, %cst {dimension_numbers = #tpu.dot_dimension_numbers<[1], [0], [0], [1], [0, 0, 1, 1], [], []>} : vector<8x32xbf16>, vector<32x32xbf16>, vector<8x32xf32> -> vector<8x32xf32>
    %c0_5 = arith.constant 0 : index
    %c0_6 = arith.constant 0 : index
    %8 = vector.load %arg5[%c0_5, %c0_6] : memref<1x32xf32, #tpu.memory_space<vmem>>, vector<1x32xf32>
    %9 = vector.broadcast %8 : vector<1x32xf32> to vector<8x32xf32>
    %10 = arith.addf %7, %9 : vector<8x32xf32>
    %11 = arith.truncf %10 : vector<8x32xf32> to vector<8x32xbf16>
    %c0_7 = arith.constant 0 : index
    %c0_8 = arith.constant 0 : index
    %c0_9 = arith.constant 0 : index
    %12 = vector.load %arg8[%c0_7, %c0_8, %c0_9] : memref<1x8x8xbf16, #tpu.memory_space<vmem>>, vector<1x8x8xbf16>
    %13 = vector.shape_cast %12 : vector<1x8x8xbf16> to vector<8x8xbf16>
    %14 = arith.extf %13 : vector<8x8xbf16> to vector<8x8xf32>
    %cst_10 = arith.constant 1.000000e+00 : f32
    %15 = vector.broadcast %cst_10 : f32 to vector<8x8xf32>
    %16 = arith.subf %15, %14 : vector<8x8xf32>
    %cst_11 = arith.constant -1.000000e+04 : f32
    %17 = vector.broadcast %cst_11 : f32 to vector<8x8xf32>
    %18 = arith.mulf %16, %17 : vector<8x8xf32>
    %19 = vector.extract_strided_slice %11 {offsets = [0, 0], sizes = [8, 16], strides = [1, 1]} : vector<8x32xbf16> to vector<8x16xbf16>
    %c0_12 = arith.constant 0 : index
    %c0_13 = arith.constant 0 : index
    %20 = vector.load %arg10[%c0_12, %c0_13] : memref<8x64xbf16, #tpu.memory_space<vmem>>, vector<8x16xbf16>
    %c0_14 = arith.constant 0 : index
    %c32 = arith.constant 32 : index
    %21 = vector.load %arg10[%c0_14, %c32] : memref<8x64xbf16, #tpu.memory_space<vmem>>, vector<8x16xbf16>
    %22 = tpu.transpose %20, [1, 0] : vector<8x16xbf16> -> vector<16x8xbf16>
    %cst_15 = arith.constant dense<0.000000e+00> : vector<8x8xf32>
    %23 = tpu.matmul %19, %22, %cst_15 {dimension_numbers = #tpu.dot_dimension_numbers<[1], [0], [0], [1], [0, 0, 1, 1], [], []>} : vector<8x16xbf16>, vector<16x8xbf16>, vector<8x8xf32> -> vector<8x8xf32>
    %24 = arith.addf %23, %18 : vector<8x8xf32>
    %cst_16 = arith.constant dense<0xFF800000> : vector<8xf32>
    %25 = vector.multi_reduction <maximumf>, %24, %cst_16 [1] : vector<8x8xf32> to vector<8xf32>
    %26 = vector.shape_cast %25 : vector<8xf32> to vector<8x1xf32>
    %27 = vector.broadcast %26 : vector<8x1xf32> to vector<8x8xf32>
    %28 = arith.subf %24, %27 : vector<8x8xf32>
    %29 = math.exp %28 : vector<8x8xf32>
    %cst_17 = arith.constant dense<0.000000e+00> : vector<8xf32>
    %30 = vector.multi_reduction <add>, %29, %cst_17 [1] : vector<8x8xf32> to vector<8xf32>
    %31 = vector.shape_cast %30 : vector<8xf32> to vector<8x1xf32>
    %32 = arith.truncf %29 : vector<8x8xf32> to vector<8x8xbf16>
    %cst_18 = arith.constant dense<0.000000e+00> : vector<8x16xf32>
    %33 = tpu.matmul %32, %21, %cst_18 {dimension_numbers = #tpu.dot_dimension_numbers<[1], [0], [0], [1], [0, 0, 1, 1], [], []>} : vector<8x8xbf16>, vector<8x16xbf16>, vector<8x16xf32> -> vector<8x16xf32>
    %34 = tpu.reciprocal %31 {approx = true} : vector<8x1xf32> -> vector<8x1xf32>
    %35 = vector.broadcast %34 : vector<8x1xf32> to vector<8x16xf32>
    %36 = arith.mulf %33, %35 : vector<8x16xf32>
    %c0_19 = arith.constant 0 : index
    %c0_20 = arith.constant 0 : index
    %37 = vector.load %arg11[%c0_19, %c0_20] : memref<8x32xf32, #tpu.memory_space<vmem>>, vector<8x16xf32>
    tpu.vector_store %arg11[%c0_19, %c0_20], %36 {strides = array<i32>} : memref<8x32xf32, #tpu.memory_space<vmem>>, vector<8x16xf32>,
    %38 = vector.extract_strided_slice %11 {offsets = [0, 16], sizes = [8, 16], strides = [1, 1]} : vector<8x32xbf16> to vector<8x16xbf16>
    %c0_21 = arith.constant 0 : index
    %c16 = arith.constant 16 : index
    %39 = vector.load %arg10[%c0_21, %c16] : memref<8x64xbf16, #tpu.memory_space<vmem>>, vector<8x16xbf16>
    %c0_22 = arith.constant 0 : index
    %c48 = arith.constant 48 : index
    %40 = vector.load %arg10[%c0_22, %c48] : memref<8x64xbf16, #tpu.memory_space<vmem>>, vector<8x16xbf16>
    %41 = tpu.transpose %39, [1, 0] : vector<8x16xbf16> -> vector<16x8xbf16>
    %cst_23 = arith.constant dense<0.000000e+00> : vector<8x8xf32>
    %42 = tpu.matmul %38, %41, %cst_23 {dimension_numbers = #tpu.dot_dimension_numbers<[1], [0], [0], [1], [0, 0, 1, 1], [], []>} : vector<8x16xbf16>, vector<16x8xbf16>, vector<8x8xf32> -> vector<8x8xf32>
    %43 = arith.addf %42, %18 : vector<8x8xf32>
    %cst_24 = arith.constant dense<0xFF800000> : vector<8xf32>
    %44 = vector.multi_reduction <maximumf>, %43, %cst_24 [1] : vector<8x8xf32> to vector<8xf32>
    %45 = vector.shape_cast %44 : vector<8xf32> to vector<8x1xf32>
    %46 = vector.broadcast %45 : vector<8x1xf32> to vector<8x8xf32>
    %47 = arith.subf %43, %46 : vector<8x8xf32>
    %48 = math.exp %47 : vector<8x8xf32>
    %cst_25 = arith.constant dense<0.000000e+00> : vector<8xf32>
    %49 = vector.multi_reduction <add>, %48, %cst_25 [1] : vector<8x8xf32> to vector<8xf32>
    %50 = vector.shape_cast %49 : vector<8xf32> to vector<8x1xf32>
    %51 = arith.truncf %48 : vector<8x8xf32> to vector<8x8xbf16>
    %cst_26 = arith.constant dense<0.000000e+00> : vector<8x16xf32>
    %52 = tpu.matmul %51, %40, %cst_26 {dimension_numbers = #tpu.dot_dimension_numbers<[1], [0], [0], [1], [0, 0, 1, 1], [], []>} : vector<8x8xbf16>, vector<8x16xbf16>, vector<8x16xf32> -> vector<8x16xf32>
    %53 = tpu.reciprocal %50 {approx = true} : vector<8x1xf32> -> vector<8x1xf32>
    %54 = vector.broadcast %53 : vector<8x1xf32> to vector<8x16xf32>
    %55 = arith.mulf %52, %54 : vector<8x16xf32>
    %c0_27 = arith.constant 0 : index
    %c16_28 = arith.constant 16 : index
    %56 = vector.load %arg11[%c0_27, %c16_28] : memref<8x32xf32, #tpu.memory_space<vmem>>, vector<8x16xf32>
    tpu.vector_store %arg11[%c0_27, %c16_28], %55 {strides = array<i32>} : memref<8x32xf32, #tpu.memory_space<vmem>>, vector<8x16xf32>,
    %c0_29 = arith.constant 0 : index
    %c0_30 = arith.constant 0 : index
    %57 = vector.load %arg11[%c0_29, %c0_30] : memref<8x32xf32, #tpu.memory_space<vmem>>, vector<8x32xf32>
    %c0_31 = arith.constant 0 : index
    %c0_32 = arith.constant 0 : index
    %c0_33 = arith.constant 0 : index
    %58 = vector.load %arg9[%c0_31, %c0_32, %c0_33] : memref<1x8x32xf32, #tpu.memory_space<vmem>>, vector<1x8x32xf32>
    %59 = vector.shape_cast %58 : vector<1x8x32xf32> to vector<8x32xf32>
    %60 = vector.shape_cast %57 : vector<8x32xf32> to vector<1x8x32xf32>
    tpu.vector_store %arg9[%c0_31, %c0_32, %c0_33], %60 {strides = array<i32>} : memref<1x8x32xf32, #tpu.memory_space<vmem>>, vector<1x8x32xf32>,
    return
  }
  func.func @transform_0(%arg0: i32, %arg1: i32) -> (i32, i32, i32) {
    %c0_i32 = arith.constant 0 : i32
    %c0_i32_0 = arith.constant 0 : i32
    return %arg0, %arg1, %c0_i32 : i32, i32, i32
  }
  func.func @transform_1(%arg0: i32, %arg1: i32) -> (i32, i32, i32) {
    %c0_i32 = arith.constant 0 : i32
    %c0_i32_0 = arith.constant 0 : i32
    %c0_i32_1 = arith.constant 0 : i32
    return %arg0, %c0_i32, %c0_i32_0 : i32, i32, i32
  }
  func.func @transform_2(%arg0: i32, %arg1: i32) -> (i32, i32) {
    %c0_i32 = arith.constant 0 : i32
    %c0_i32_0 = arith.constant 0 : i32
    %c0_i32_1 = arith.constant 0 : i32
    return %c0_i32, %c0_i32_0 : i32, i32
  }
  func.func @transform_3(%arg0: i32, %arg1: i32) -> (i32, i32) {
    %c0_i32 = arith.constant 0 : i32
    %c0_i32_0 = arith.constant 0 : i32
    %c0_i32_1 = arith.constant 0 : i32
    return %c0_i32, %c0_i32_0 : i32, i32
  }
  func.func @transform_4(%arg0: i32, %arg1: i32) -> (i32, i32) {
    %c0_i32 = arith.constant 0 : i32
    %c0_i32_0 = arith.constant 0 : i32
    %c0_i32_1 = arith.constant 0 : i32
    return %c0_i32, %c0_i32_0 : i32, i32
  }
  func.func @transform_5(%arg0: i32, %arg1: i32) -> (i32, i32) {
    %c0_i32 = arith.constant 0 : i32
    %c0_i32_0 = arith.constant 0 : i32
    %c0_i32_1 = arith.constant 0 : i32
    return %c0_i32, %c0_i32_0 : i32, i32
  }
  func.func @transform_6(%arg0: i32, %arg1: i32) -> (i32, i32, i32) {
    %c0_i32 = arith.constant 0 : i32
    %c0_i32_0 = arith.constant 0 : i32
    return %arg0, %arg1, %c0_i32 : i32, i32, i32
  }
  func.func @transform_7(%arg0: i32, %arg1: i32) -> (i32, i32, i32) {
    %c0_i32 = arith.constant 0 : i32
    %c0_i32_0 = arith.constant 0 : i32
    return %arg0, %arg1, %c0_i32 : i32, i32, i32
  }
}

</mosaic_0001>

<bundles_post_ra>
// kernel: tpu_custom_call.1
= control target key start
LH: loop header
LB: loop body
LE: loop exit
PB: predicated region body
PF: predicated region fallthrough
CT: control target
= control target key end

     0   :  { %s1745_s0 = inlined_call_operand.hbm [shape: f32[2,8,32], index: 0, kind: input, shape index: {}]   ;;  %s1746_s1 = inlined_call_operand.hbm [shape: f32[2,8,32], index: 1, kind: input, shape index: {}]   ;;  %s1747_s2 = inlined_call_operand.hbm [shape: bf16[32,32], index: 2, kind: input, shape index: {}]   ;;  %s1748_s3 = inlined_call_operand.vmem [shape: f32[1,32], index: 3, kind: input, shape index: {}]   ;;  %s1749_s4 = inlined_call_operand.hbm [shape: bf16[32,64], index: 4, kind: input, shape index: {}]   ;;  %s1750_s5 = inlined_call_operand.vmem [shape: f32[1,64], index: 5, kind: input, shape index: {}]   ;;  %s1751_s6 = inlined_call_operand.vmem [shape: bf16[2,8,8], index: 6, kind: input, shape index: {}]   ;;  %s1752_s7 = inlined_call_operand.hbm [shape: f32[2,8,32], index: 7, kind: output, shape index: {}]  }
   0x1   :  { %1760 = sst [smem:[#allocation22_spill]] %s1747_s2 }
   0x2   :  { %1761 = sst [smem:[#allocation23_spill]] %s1749_s4 }
   0x3   :  { %12 = vsyncpa [#allocation5], 0 }
   0x4   :  { %14 = vsyncpa [#allocation5 + $0x1], 0 }
   0x5   :  { %15 = vsyncpa [#allocation8], 0 }
   0x6   :  { %17 = vsyncpa [#allocation8 + $0x1], 0 }
   0x7   :  { %18 = vsyncpa [#allocation11], 0 }
   0x8   :  { %19 = vsyncpa [#allocation6], 0 }
   0x9   :  { %21 = vsyncpa [#allocation6 + $0x1], 0  ;;  %s1409_s24 = smov 0   ;;  %s1411_s25 = smov 0  }
   0xa   :  { %s1413_s26 = smov 0   ;;  %s1415_s27 = smov 0  }
   0xb   :  { %s1417_s28 = smov 0   ;;  %s1419_s29 = smov 0  }
   0xc LB: > { %1762 = sst [smem:[#allocation18_spill]] %s1350_s28  ;;  %s1440_s30 = sadd.s32 4294967295, %s1354_s29   ;;  %s1354_s29 = sphi %s1419_s29, %s27_s29   ;;  %s1350_s28 = sphi %s1417_s28, %s1787_s28   ;;  %s1346_s27 = sphi %s1415_s27, %s1786_s27   ;;  %s1342_s26 = sphi %s1413_s26, %s1790_s26   ;;  %s1338_s25 = sphi %s1411_s25, %s1789_s25   ;;  %s1334_s24 = sphi %s1409_s24, %s1788_s24  }
   0xd   : > { %s946_s8 = sadd.s32 4294967294, %s1354_s29   ;;  %p61_p0 = scmp.ne.s32.totalorder %s1338_s25, %s1334_s24 }
   0xe   : > { %p1753_p1 = scmp.eq.s32.totalorder %s1440_s30, 0  ;;  %p231_p3 = scmp.eq.s32.totalorder %s946_s8, 1 }
   0xf   : > { %p947_p5 = scmp.ge.s32.totalorder %s1354_s29, 1  ;;  %p238_p7 = scmp.lt.s32.totalorder %s1354_s29, 3 }
  0x10   : > { %p1449_p4 = por %p1753_p1, %p61_p0  ;;  %p1454_p6 = por %p231_p3, %p61_p0 }
  0x11   : > { %p1459_p8 = pnand %p947_p5, %p238_p7  ;;  %s1356_s12 = smov [#allocation9]  }
  0x12   : > { %s1763_s9 = scalar_select %p1449_p4, 1, 0 }
  0x13   : > { %s1764_s10 = scalar_select %p1454_p6, 1, 0 }
  0x14   : > { %s1766_s11 = scalar_select %p1459_p8, 1, 0 }
  0x15   : > { %1765 = sst [smem:[#allocation19_spill]] %s1764_s10  ;;  %s250_s13 = sshll.u32 %s1356_s12, 4  ;;  %s1463_s13 = int_to_ptr.vmem [resolvable:$true] %s250_s13 }
  0x16   : > { %p1048_p9 = pneg %p1459_p8  ;;  %s1357_s15 = smov [#allocation10]  }
  0x17   : > { %s266_s16 = sshll.u32 %s1357_s15, 4  ;;  %s1768_s2 = sld [smem:[#allocation22_spill]]  ;;  %s1474_s16 = int_to_ptr.vmem [resolvable:$true] %s266_s16 }
  0x18   : > { %p1470_p11 = pnand %p1048_p9, %p1753_p1 }
  0x1a   : > { %p1146_p13 = pneg %p1470_p11 }
  0x1d   : > { %s1144_s19 = scalar_lea.hbm %s1768_s2, 256 }
  0x1e   : > { %p1145_p12 = scmp.ne.s32.totalorder %s1768_s2, %s1144_s19  ;;  %p1151_p5 = scmp.lt.u32.totalorder %s1144_s19, %s1768_s2 }
  0x20   : > { %p1147_p0 = pnand %p1146_p13, %p1145_p12 }
  0x22   : > { %p1148_p3 = pneg %p1147_p0 }
  0x24   : > { %p1153_p7 = pnand %p1151_p5, %p1148_p3 }
  0x26   : > { %1156 = shalt.err (!%p1153_p7)
}
  0x27   : > { %s1157_s8 = scalar_lea.vmem %s1463_s13, 256  ;;  %p1165_p2 = scmp.lt.s32.totalorder %s1463_s13, %s1463_s13 }
  0x28   : > { %p1158_p9 = scmp.ne.s32.totalorder %s1463_s13, %s1157_s8  ;;  %p1166_p12 = scmp.lt.s32.totalorder %s1157_s8, %s1157_s8 }
  0x2a   : > { %p1160_p10 = pnand %p1158_p9, %p1146_p13  ;;  %p1167_p0 = por %p1166_p12, %p1165_p2 }
  0x2c   : > { %p1161_p1 = pneg %p1160_p10 }
  0x2e   : > { %p1168_p6 = pnand %p1167_p0, %p1161_p1 }
  0x30   : > { %1171 = shalt.err (!%p1168_p6)
}
  0x31   : > { %s1358_s12 = smov 64   ;;  %s1359_s15 = smov 4  }
  0x32   : > { %1051 = dma.hbm_to_vmem [thread:$0]  (!%p1470_p11), %s1768_s2, 256, %s1463_s13, [#allocation8], %s1358_s12, %s1358_s12, %s1359_s15  }
  0x33   : > { %s1769_s4 = sld [smem:[#allocation23_spill]] }
  0x39   : > { %s1172_s21 = scalar_lea.hbm %s1769_s4, 256 }
  0x3a   : > { %p1173_p2 = scmp.ne.s32.totalorder %s1769_s4, %s1172_s21  ;;  %p1179_p10 = scmp.lt.u32.totalorder %s1172_s21, %s1769_s4 }
  0x3c   : > { %p1175_p1 = pnand %p1173_p2, %p1146_p13 }
  0x3e   : > { %p1176_p6 = pneg %p1175_p1 }
  0x40   : > { %p1181_p3 = pnand %p1179_p10, %p1176_p6 }
  0x42   : > { %1184 = shalt.err (!%p1181_p3)
}
  0x43   : > { %s1185_s13 = scalar_lea.vmem %s1474_s16, 256  ;;  %p1193_p12 = scmp.lt.s32.totalorder %s1474_s16, %s1474_s16 }
  0x44   : > { %p1186_p5 = scmp.ne.s32.totalorder %s1474_s16, %s1185_s13  ;;  %p1194_p0 = scmp.lt.s32.totalorder %s1185_s13, %s1185_s13 }
  0x46   : > { %p1188_p7 = pnand %p1186_p5, %p1146_p13  ;;  %p1195_p2 = por %p1194_p0, %p1193_p12 }
  0x48   : > { %p1189_p9 = pneg %p1188_p7 }
  0x4a   : > { %p1196_p1 = pnand %p1195_p2, %p1189_p9 }
  0x4c   : > { %1199 = shalt.err (!%p1196_p1)
}
  0x4d   : > { %1054 = dma.hbm_to_vmem [thread:$0]  (!%p1470_p11), %s1769_s4, 256, %s1474_s16, [#allocation11], %s1358_s12, %s1358_s12, %s1359_s15  }
  0x4e   : > { %s39_s18 = sadd.s32 1, %s1350_s28  ;;  %s48_s19 = sadd.s32 1, %s1342_s26 }
  0x4f   : > { %p41_p13 = scmp.ge.s32.totalorder %s39_s18, 2  ;;  %p55_p6 = scmp.ne.s32.totalorder %s1342_s26, %s1338_s25 }
  0x50   : > { %p56_p10 = scmp.eq.s32.totalorder %s1354_s29, 0  ;;  %p1068_p3 = scmp.lt.s32.totalorder %s1354_s29, 2 }
  0x51   : > { %s1792_s18 = smov (%p41_p13, %s39_s18), 0  ;;  %p1771_p7 = scmp.eq.s32.totalorder %s1440_s30, 1 }
  0x52   : > { %1770 = sst [smem:[#allocation20_spill]] %s1792_s18  ;;  %p57_p5 = por %p56_p10, %p55_p6 }
  0x53   : > { %p1538_p9 = por %p1771_p7, %p55_p6  ;;  %s43_s20 = ssub.s32 %s1350_s28, %s1792_s18 }
  0x54   : > { %s283_s21 = sand.u32 1, %s1342_s26   ;;  %p46_p12 = scmp.eq.s32.totalorder %s43_s20, 0 }
  0x55   : > { %s1772_s14 = scalar_select %p1538_p9, 1, 0 }
  0x56   : > { %s1545_s16 = sshll.u32 %s283_s21, 3  ;;  %s952_s12 = sshll.u32 %s1350_s28, 7 }
  0x57   : > { %s1549_s15 = scalar_select %p46_p12, %s1342_s26, %s48_s19  }
  0x58   : > { %s1554_s8 = scalar_lea.hbm %s1745_s0, %s952_s12  ;;  %s287_s13 = scalar_lea.vmem [#allocation4], %s1545_s16 }
  0x59   : > { %1773 = sst [smem:[#allocation21_spill]] %s1549_s15  ;;  %s295_s10 = sshll.u32 %s287_s13, 4  ;;  %s1563_s10 = int_to_ptr.vmem [resolvable:$true] %s295_s10 }
  0x5a   : > { %p1559_p11 = pnand %p1068_p3, %p57_p5  ;;  %s1568_s22 = scalar_lea.hbm %s1746_s1, %s952_s12 }
  0x5b   : > { %s284_s23 = scalar_lea.sflag [#allocation5], %s283_s21  ;;  %s1200_s2 = scalar_lea.hbm %s1554_s8, 128 }
  0x5c   : > { %p1201_p0 = scmp.ne.s32.totalorder %s1554_s8, %s1200_s2  ;;  %p1202_p2 = pneg %p1559_p11 }
  0x5d   : > { %s1205_s18 = scalar_lea.hbm %s1745_s0, 256  ;;  %p1206_p6 = scmp.lt.u32.totalorder %s1554_s8, %s1745_s0 }
  0x5e   : > { %p1203_p1 = pnand %p1202_p2, %p1201_p0  ;;  %p1207_p10 = scmp.lt.u32.totalorder %s1205_s18, %s1200_s2 }
  0x5f   : > { %p1209_p5 = scmp.lt.u32.totalorder %s1200_s2, %s1554_s8 }
  0x60   : > { %p1204_p13 = pneg %p1203_p1  ;;  %p1208_p3 = por %p1207_p10, %p1206_p6 }
  0x62   : > { %p1210_p7 = por %p1209_p5, %p1208_p3 }
  0x64   : > { %p1211_p12 = pnand %p1210_p7, %p1204_p13 }
  0x66   : > { %1214 = shalt.err (!%p1211_p12)
}
  0x67   : > { %s1215_s21 = scalar_lea.vmem %s1563_s10, 128  ;;  %s1360_s4 = smov [#allocation4]  }
  0x68   : > { %p1216_p0 = scmp.ne.s32.totalorder %s1563_s10, %s1215_s21  ;;  %s1220_s12 = sshll.u32 %s1360_s4, 4  ;;  %s1221_s12 = int_to_ptr.vmem [resolvable:$false] %s1220_s12 }
  0x69   : > { %s1222_s28 = scalar_lea.vmem %s1221_s12, 256  ;;  %p1223_p4 = scmp.lt.s32.totalorder %s1563_s10, %s1221_s12 }
  0x6a   : > { %p1218_p1 = pnand %p1216_p0, %p1202_p2  ;;  %p1224_p6 = scmp.lt.s32.totalorder %s1222_s28, %s1215_s21 }
  0x6c   : > { %p1219_p9 = pneg %p1218_p1  ;;  %p1225_p10 = por %p1224_p6, %p1223_p4 }
  0x6e   : > { %p1226_p3 = pnand %p1225_p10, %p1219_p9 }
  0x70   : > { %1229 = shalt.err (!%p1226_p3)
}
  0x71   : > { %1058 = dma.hbm_to_vmem [thread:$0]  (!%p1559_p11), %s1554_s8, 128, %s1563_s10, %s284_s23  }
  0x72   : > { %s302_s2 = sand.u32 1, %s1354_s29   ;;  %s306_s18 = scalar_lea.vmem [#allocation7], %s1545_s16 }
  0x73   : > { %s313_s15 = sshll.u32 %s306_s18, 4  ;;  %s303_s19 = scalar_lea.sflag [#allocation8], %s302_s2  ;;  %s314_s15 = int_to_ptr.vmem [resolvable:$true] %s313_s15 }
  0x74   : > { %s1230_s20 = scalar_lea.hbm %s1568_s22, 128  ;;  %s1235_s4 = scalar_lea.hbm %s1746_s1, 256 }
  0x75   : > { %p1231_p4 = scmp.ne.s32.totalorder %s1568_s22, %s1230_s20  ;;  %p1236_p5 = scmp.lt.u32.totalorder %s1568_s22, %s1746_s1 }
  0x76   : > { %p1237_p7 = scmp.lt.u32.totalorder %s1235_s4, %s1230_s20  ;;  %p1239_p0 = scmp.lt.u32.totalorder %s1230_s20, %s1568_s22 }
  0x77   : > { %p1233_p9 = pnand %p1231_p4, %p1202_p2 }
  0x78   : > { %p1238_p12 = por %p1237_p7, %p1236_p5 }
  0x79   : > { %p1234_p13 = pneg %p1233_p9 }
  0x7a   : > { %p1240_p1 = por %p1239_p0, %p1238_p12 }
  0x7c   : > { %p1241_p6 = pnand %p1240_p1, %p1234_p13 }
  0x7e   : > { %1244 = shalt.err (!%p1241_p6)
}
  0x7f   : > { %s1245_s16 = scalar_lea.vmem %s314_s15, 128  ;;  %s1361_s8 = smov [#allocation7]  }
  0x80   : > { %p1246_p10 = scmp.ne.s32.totalorder %s314_s15, %s1245_s16  ;;  %s1250_s10 = sshll.u32 %s1361_s8, 4  ;;  %s1251_s10 = int_to_ptr.vmem [resolvable:$false] %s1250_s10 }
  0x81   : > { %s1252_s23 = scalar_lea.vmem %s1251_s10, 256  ;;  %p1253_p9 = scmp.lt.s32.totalorder %s314_s15, %s1251_s10 }
  0x82   : > { %p1248_p3 = pnand %p1246_p10, %p1202_p2  ;;  %p1254_p8 = scmp.lt.s32.totalorder %s1252_s23, %s1245_s16 }
  0x84   : > { %p1249_p4 = pneg %p1248_p3  ;;  %p1255_p5 = por %p1254_p8, %p1253_p9 }
  0x86   : > { %p1256_p7 = pnand %p1255_p5, %p1249_p4 }
  0x88   : > { %1259 = shalt.err (!%p1256_p7)
}
  0x89   : > { %1061 = dma.hbm_to_vmem [thread:$0]  (!%p1559_p11), %s1568_s22, 128, %s314_s15, %s303_s19  }
  0x8a   : > { %p1775_p13 = scmp.ne.s32.totalorder %s1766_s11, 0 }
  0x8b   : > { %s1619_s2 = sand.u32 (!%p1775_p13), 1, %s1338_s25   ;;  %p1776_p8 = scmp.ne.s32.totalorder (!%p1775_p13), %s1763_s9, 0 }
  0x8c   : > { %332 = sbr.rel (%p1775_p13) target bundleno = 1241 (0x4d9), region = 48  ;;  %s1622_s18 = sshll.u32 (!%p1775_p13), %s1619_s2, 3 }
  0x8d   : > { %s335_s20 = scalar_lea.sflag (!%p1775_p13), [#allocation5], %s1619_s2  ;;  %s338_s13 = scalar_lea.vmem (!%p1775_p13), [#allocation4], %s1622_s18 }
  0x93   : > { %1313 = dma.done.wait (%p1776_p8), %s335_s20, 128  }
  0x94   : > { %1315 = vsyncadd (%p1776_p8), %s335_s20, 4294967168  ;;  %s343_s11 = sand.u32 1, %s1440_s30   ;;  %s347_s22 = scalar_lea.vmem [#allocation7], %s1622_s18 }
  0x95   : > { %s344_s17 = scalar_lea.sflag [#allocation8], %s343_s11 }
  0x96   : > { %1317 = dma.done.wait (%p1776_p8), %s344_s17, 128  }
  0x97   : > { %1319 = vsyncadd (%p1776_p8), %s344_s17, 4294967168  ;;  %p1777_p11 = scmp.eq.s32.totalorder %s1440_s30, 0 }
  0x99   : > { %1321 = dma.done.wait (%p1777_p11), [#allocation8], 256   ;;  %p1778_p2 = pmov %p1777_p11 }
  0x9b   : > { %1323 = vsyncadd (%p1778_p2), [#allocation8], 4294967040  ;;  %p1779_p12 = pmov %p1778_p2 }
  0x9c   : > { %p1780_p0 = pmov %p1778_p2 }
  0x9d   : > { %1325 = dma.done.wait (%p1779_p12), [#allocation11], 256  }
  0x9e   : > { %1327 = vsyncadd (%p1780_p0), [#allocation11], 4294967040  ;;  %v1362_v0 = vmov 0.0   ;;  %vm1363_vm0 = vmmov 0   ;;  %v1130_v1 = vld [vmem:[#allocation10] sm:$0xff]   ;;  %v1131_v2 = vld [vmem:[#allocation10 + $0x8] sm:$0xff]  }
  0x9f   : > { %994 = vmatprep.subr.bf16.mxu0 %v1362_v0  ;;  %998 = vmatprep.mubr.msk.bf16.mxu0 %vm1363_vm0, %v1362_v0  ;;  %v410_v3 = vld [vmem:[%s347_s22] sm:$0xff]  ;;  %v1132_v4 = vld [vmem:[#allocation9] sm:$0xff]   ;;  %v1133_v6 = vld [vmem:[#allocation9 + $0x8] sm:$0xff]   ;;  %vm435_vm1 = vcmask 261120   ;;  %vm480_vm2 = vcmask 519168   ;;  %vm557_vm3 = vcmask 130048  }
  0xa0   : > { %1002 = vmatprep.subr.bf16.mxu1 %v1362_v0  ;;  %1006 = vmatprep.mubr.msk.bf16.mxu1 %vm1363_vm0, %v1362_v0  ;;  %v411_v5 = vpack.c.bf16 %v410_v3, %v410_v3  ;;  %v482_v7 = vld [vmem:[%s338_s13] sm:$0xff]  ;;  %v962_v9 = vld [vmem:[%s1750_s5] ss:$0 sm:$0xff]  ;;  %s1364_s21 = smov 112   ;;  %s1365_s4 = smov 96   ;;  %vm623_vm4 = vcmask 1043456  }
  0xa1   : > { %995 = vmatpush3.bf16.msra.mxu0 %v1130_v1  ;;  %1003 = vmatpush3.bf16.msra.mxu1 %v1132_v4  ;;  %v483_v8 = vpack.c.bf16 %v482_v7, %v482_v7  ;;  %v966_v20 = vld [vmem:[%s1748_s3] ss:$0 sm:$0xff]  ;;  %p398_p1 = scmp.lt.s32.totalorder %s1346_s27, 1  ;;  %vm604_vm5 = vcmask 64512   ;;  %s1366_s23 = smov 80   ;;  %vm789_vm6 = vcmask 261248  }
  0xa2   : > { %996 = vmatprep.subr.bf16.mxu0 %v1362_v0  ;;  %1004 = vmatprep.subr.bf16.mxu1 %v1362_v0  ;;  %s1367_s20 = smov 16   ;;  %s977_s13 = sshll.u32 %s1346_s27, 7 }
  0xa3   : > { %s399_s12 = scalar_select %p398_p1, %s1346_s27, 1 }
  0xa4   : > { %s397_s11 = scalar_lea.vmem [#allocation12], %s1622_s18  ;;  %s1695_s9 = scalar_lea.hbm %s1752_s7, %s977_s13 }
  0xa5   : > { %997 = vmatpush3.bf16.msra.mxu0 %v1131_v2  ;;  %1005 = vmatpush3.bf16.msra.mxu1 %v1133_v6  ;;  %s961_s28 = sshll.u32 %s399_s12, 2  ;;  %s808_s17 = sshll.u32 %s397_s11, 4  ;;  %s1697_s17 = int_to_ptr.vmem [resolvable:$true] %s808_s17 }
  0xa6   : > { %1010 = vmatprep.subr.bf16.mxu0 %v1362_v0  ;;  %1016 = vmatprep.subr.bf16.mxu1 %v1362_v0  ;;  %s404_s10 = scalar_lea.vmem %s1751_s6, %s961_s28  ;;  %s794_s15 = scalar_lea.sflag [#allocation6], %s1619_s2 }
  0xa7   : > { %v552_v32 = vld [vmem:[%s404_s10] sm:$0xf]  ;;  %s1260_s19 = scalar_lea.vmem %s1697_s17, 128  ;;  %p1781_p10 = scmp.ne.s32.totalorder %s1772_s14, 0 }
  0xa8   : > { %999 = vmatmul.mubr.msk.bf16.vlgmr.msra.gmra.mrb[0].mxu0 %vm435_vm1, %v411_v5  ;;  %1007 = vmatmul.mubr.msk.bf16.vlgmr.msra.gmra.mrb[0].mxu1 %vm435_vm1, %v483_v8  ;;  %v553_v33 = vunpack.c.l.bf16 %v552_v32  ;;  %p1261_p6 = scmp.ne.s32.totalorder %s1697_s17, %s1260_s19  ;;  %s1368_s27 = smov [#allocation12]  }
  0xa9   : > { %1012 = vmatprep.mubr.msk.bf16.mxu0 %vm1363_vm0, %v1362_v0  ;;  %1018 = vmatprep.mubr.msk.bf16.mxu1 %vm1363_vm0, %v1362_v0  ;;  %s1264_s18 = sshll.u32 %s1368_s27, 4  ;;  %s1265_s18 = int_to_ptr.vmem [resolvable:$false] %s1264_s18 }
  0xaa   : > { %v554_v34 = vsub.f32 1.0, %v553_v33  ;;  %p1262_p3 = pnand %p1261_p6, %p1781_p10  ;;  %p1267_p9 = scmp.lt.s32.totalorder %s1697_s17, %s1265_s18 }
  0xac   : > { %v555_v35 = vmul.f32 -10000.0, %v554_v34  ;;  %p1263_p4 = pneg %p1262_p3 }
 0x17b   : > { %v473_v10 = vpop.f32.mrb[0].mxu0  ;;  %v545_v16 = vpop.f32.mrb[0].mxu1 }
 0x17c   : > { %v474_v11 = vadd.f32 %v962_v9, %v473_v10  ;;  %v1000_v12 = vpop.f32.mrb[1].mxu0  ;;  %v1008_v17 = vpop.f32.mrb[1].mxu1  ;;  %v546_v21 = vadd.f32 %v966_v20, %v545_v16 }
 0x17d   : > { %v476_v13 = vpop.f32.mrb[2].mxu0  ;;  %v548_v18 = vpop.f32.mrb[2].mxu1 }
 0x17e   : > { %v479_v14 = vpack.c.bf16 %v474_v11, %v474_v11  ;;  %v1001_v15 = vpop.f32.mrb[3].mxu0  ;;  %v1009_v19 = vpop.f32.mrb[3].mxu1  ;;  %v551_v25 = vpack.c.bf16 %v546_v21, %v546_v21 }
 0x180   : > { %481 = vst.msk [vmem:[#allocation2] sm:$0xf] %vm480_vm2, %v479_v14 }
 0x187   : > { %v556_v22 = vld [vmem:[#allocation2] sm:$0xf] }
 0x188   : > { %v1134_v23 = vld [vmem:[#allocation2] ss:$0 sps:$4 sm:$0xff]   ;;  %v562_v24 = vsel %vm557_vm3, %v556_v22, 0  ;;  %v971_v26 = vcombine.low %v556_v22, %v556_v22 }
 0x189   : > { %1011 = vmatpush3.bf16.xpose.msra.mxu0 %v562_v24  ;;  %677 = vrot.lane.b32.xlu0 %v1134_v23, %s1364_s21 }
 0x18a   : > { %1022 = vmatprep.subr.bf16.mxu0 %v1362_v0 }
 0x18d   : > { %672 = vrot.lane.b32.xlu0 %v551_v25, %s1364_s21  ;;  %s1266_s21 = scalar_lea.vmem %s1265_s18, 256 }
 0x18e   : > { %p1268_p5 = scmp.lt.s32.totalorder %s1266_s21, %s1260_s19 }
 0x190   : > { %1013 = vmatmul.mubr.msk.bf16.vlgmr.msra.gmra.mrb[4].mxu0 %vm557_vm3, %v551_v25  ;;  %p1269_p7 = por %p1268_p5, %p1267_p9 }
 0x191   : > { %618 = vrot.lane.b32.xlu0 %v971_v26, %s1365_s4  ;;  %1024 = vmatprep.mubr.msk.bf16.mxu0 %vm1363_vm0, %v1362_v0 }
 0x192   : > { %p1270_p13 = pnand %p1269_p7, %p1263_p4 }
 0x1fb   : > { %v678_v27 = vpop.permute.xlu0 %677 }
 0x1fc   : > { %v683_v28 = vsel %vm557_vm3, %v678_v27, 0 }
 0x1fd   : > { %1023 = vmatpush3.bf16.xpose.msra.mxu0 %v683_v28 }
 0x1ff   : > { %v673_v29 = vpop.permute.xlu0 %672 }
 0x203   : > { %v619_v30 = vpop.permute.xlu0 %618 }
 0x204   : > { %v625_v31 = vsel %vm623_vm4, %v619_v30, 0  ;;  %1025 = vmatmul.mubr.msk.bf16.vlgmr.msra.gmra.mrb[8].mxu0 %vm557_vm3, %v673_v29 }
 0x205   : > { %1017 = vmatpush3.bf16.msra.mxu1 %v625_v31 }
 0x206   : > { %1028 = vmatprep.subr.bf16.mxu1 %v1362_v0 }
 0x263   : > { %v598_v36 = vpop.f32.mrb[4].mxu0 }
 0x264   : > { %v599_v37 = vadd.f32 %v598_v36, %v555_v35  ;;  %v1014_v38 = vpop.f32.mrb[5].mxu0 }
 0x265   : > { %v601_v39 = vpop.f32.mrb[6].mxu0 }
 0x266   : > { %v1015_v40 = vpop.f32.mrb[7].mxu0  ;;  %v605_v41 = vsel %vm604_vm5, %v599_v37, -inf }
 0x267   : > { %606 = vmax.xlane.f32.xlu1 %v605_v41 }
 0x2d7   : > { %v719_v42 = vpop.f32.mrb[8].mxu0 }
 0x2d8   : > { %v720_v43 = vadd.f32 %v719_v42, %v555_v35  ;;  %v1026_v44 = vpop.f32.mrb[9].mxu0 }
 0x2d9   : > { %v722_v45 = vpop.f32.mrb[10].mxu0 }
 0x2da   : > { %v1027_v46 = vpop.f32.mrb[11].mxu0  ;;  %v725_v47 = vsel %vm604_vm5, %v720_v43, -inf }
 0x2db   : > { %726 = vmax.xlane.f32.xlu1 %v725_v47 }
 0x2ec   : > { %735 = vrot.lane.b32.xlu1 %v1134_v23, %s1366_s23 }
 0x2f4   : > { %v607_v48 = vpop.xlane.xlu1 %606 }
 0x2f5   : > { %v608_v49 = vsub.f32 %v599_v37, %v607_v48 }
 0x2f7   : > { %v609_v50 = vmul.f32 1.442695, %v608_v49 }
 0x2f9   : > { %1136 = vpow2.f32 %v609_v50 }
 0x303   : > { %v1137_v51 = vpop.eup %1136 }
 0x304   : > { %v614_v52 = vpack.c.bf16 %v1137_v51, %v1137_v51  ;;  %v611_v53 = vsel %vm604_vm5, %v1137_v51, 0.0 }
 0x306   : > { %1019 = vmatmul.mubr.msk.bf16.vlgmr.msra.gmra.mrb[4].mxu1 %vm604_vm5, %v614_v52 }
 0x307   : > { %1030 = vmatprep.mubr.msk.bf16.mxu1 %vm1363_vm0, %v1362_v0 }
 0x310   : > { %612 = vadd.xlane.f32.xlu1 %v611_v53 }
 0x368   : > { %v727_v54 = vpop.xlane.xlu1 %726 }
 0x369   : > { %v728_v55 = vsub.f32 %v720_v43, %v727_v54 }
 0x36b   : > { %v729_v56 = vmul.f32 1.442695, %v728_v55 }
 0x36c   : > { %v736_v57 = vpop.permute.xlu1 %735 }
 0x36d   : > { %1138 = vpow2.f32 %v729_v56  ;;  %v741_v58 = vsel %vm623_vm4, %v736_v57, 0 }
 0x36e   : > { %1029 = vmatpush3.bf16.msra.mxu1 %v741_v58 }
 0x377   : > { %v1139_v59 = vpop.eup %1138 }
 0x378   : > { %v731_v60 = vsel %vm604_vm5, %v1139_v59, 0.0  ;;  %v734_v61 = vpack.c.bf16 %v1139_v59, %v1139_v59 }
 0x379   : > { %732 = vadd.xlane.f32.xlu0 %v731_v60 }
 0x37a   : > { %1031 = vmatmul.mubr.msk.bf16.vlgmr.msra.gmra.mrb[8].mxu1 %vm604_vm5, %v734_v61 }
 0x39d   : > { %v613_v62 = vpop.xlane.xlu1 %612 }
 0x39e   : > { %1140 = vrcp.f32 %v613_v62 }
 0x3a8   : > { %v1141_v63 = vpop.eup %1140 }
 0x3d9   : > { %v661_v0 = vpop.f32.mrb[4].mxu1 }
 0x3da   : > { %v668_v1 = vmul.f32 %v1141_v63, %v661_v0  ;;  %v1020_v2 = vpop.f32.mrb[5].mxu1 }
 0x3db   : > { %v664_v3 = vpop.f32.mrb[6].mxu1 }
 0x3dc   : > { %669 = vst.msk [vmem:[#allocation3] sm:$0xff] %vm557_vm3, %v668_v1  ;;  %v1021_v4 = vpop.f32.mrb[7].mxu1 }
 0x406   : > { %v733_v5 = vpop.xlane.xlu0 %732 }
 0x407   : > { %1142 = vrcp.f32 %v733_v5 }
 0x411   : > { %v1143_v6 = vpop.eup %1142 }
 0x44d   : > { %v777_v7 = vpop.f32.mrb[8].mxu1 }
 0x44e   : > { %v784_v8 = vmul.f32 %v1143_v6, %v777_v7  ;;  %v1032_v9 = vpop.f32.mrb[9].mxu1 }
 0x44f   : > { %v780_v10 = vpop.f32.mrb[10].mxu1 }
 0x450   : > { %786 = vrot.lane.b32.xlu0 %v784_v8, %s1367_s20  ;;  %v1033_v11 = vpop.f32.mrb[11].mxu1 }
 0x4c2   : > { %v787_v12 = vpop.permute.xlu0 %786 }
 0x4c3   : > { %790 = vst.msk [vmem:[#allocation3] sm:$0xff] %vm789_vm6, %v787_v12 }
 0x4ca   : > { %v791_v13 = vld [vmem:[#allocation3] sm:$0xff] }
 0x4cb   : > { %792 = vst.msk [vmem:[%s397_s11] sm:$0xff] %vm435_vm1, %v791_v13 }
 0x4cc   : > { %1273 = shalt.err (!%p1270_p13)
}
 0x4cd   : > { %s1274_s2 = scalar_lea.hbm %s1695_s9, 128  ;;  %s1278_s28 = scalar_lea.hbm %s1752_s7, 256 }
 0x4ce   : > { %p1275_p8 = scmp.ne.s32.totalorder %s1695_s9, %s1274_s2  ;;  %p1279_p12 = scmp.lt.u32.totalorder %s1695_s9, %s1752_s7 }
 0x4cf   : > { %p1280_p0 = scmp.lt.u32.totalorder %s1278_s28, %s1274_s2  ;;  %p1282_p6 = scmp.lt.u32.totalorder %s1274_s2, %s1695_s9 }
 0x4d0   : > { %p1276_p11 = pnand %p1275_p8, %p1781_p10 }
 0x4d1   : > { %p1281_p1 = por %p1280_p0, %p1279_p12 }
 0x4d2   : > { %p1277_p2 = pneg %p1276_p11 }
 0x4d3   : > { %p1283_p3 = por %p1282_p6, %p1281_p1 }
 0x4d5   : > { %p1284_p4 = pnand %p1283_p3, %p1277_p2 }
 0x4d7   : > { %1287 = shalt.err (!%p1284_p4)
}
 0x4d8   : > { %1046 = dma.vmem_to_hbm [thread:$0]  (%p1781_p10), %s1697_s17, 128, %s1695_s9, %s794_s15  }
 0x4d9 PF: > { %s1782_s10 = sld [smem:[#allocation19_spill]]  ;;  %s820_s23 = sand.u32 1, %s1334_s24  }
 0x4da   : > { %p1784_p5 = scmp.ge.s32.totalorder %s1354_s29, 2  ;;  %s821_s20 = scalar_lea.sflag [#allocation6], %s820_s23 }
 0x4df   : > { %p1783_p9 = scmp.ne.s32.totalorder %s1782_s10, 0 }
 0x4e1   : > { %p1063_p7 = pnand %p1784_p5, %p1783_p9 }
 0x4e3   : > { %1329 = dma.done.wait (!%p1063_p7), %s821_s20, 128  }
 0x4e4   : > { %1331 = vsyncadd (!%p1063_p7), %s821_s20, 4294967168  ;;  %s27_s29 = sadd.s32 1, %s1354_s29   ;;  %s1785_s14 = sld [smem:[#allocation21_spill]] }
 0x4e5   : > { %p24_p13 = scmp.ge.s32.totalorder %s27_s29, 4   ;;  %s1786_s27 = sld [smem:[#allocation18_spill]] }
 0x4e6   : > { %s1787_s28 = sld [smem:[#allocation20_spill]]  ;;  %s1788_s24 = smov %s1338_s25 }
 0x4e7   : > { %s1789_s25 = smov %s1342_s26  ;;  %26 = sbr.rel (!%p24_p13) target bundleno = 12 (0xc), region = 121 }
 0x4ea   : > { %s1790_s26 = smov %s1785_s14 }
 0x4ee   :  { %826 = vsyncpa [#allocation5], 1 }
 0x4ef   :  { %828 = vsyncpa [#allocation5 + $0x1], 1 }
 0x4f0   :  { %829 = vsyncpa [#allocation8], 1 }
 0x4f1   :  { %831 = vsyncpa [#allocation8 + $0x1], 1 }
 0x4f2   :  { %832 = vsyncpa [#allocation11], 1 }
 0x4f3   :  { %833 = vsyncpa [#allocation6], 1 }
 0x4f4   :  { %835 = vsyncpa [#allocation6 + $0x1], 1 }

</bundles_post_ra>
